<compile_context>
chip_gen: v6e
topology: v6e:2x2x1
jax: 0.10.0
libtpu: 0.0.40
codegen_flags: <defaults>
</compile_context>

<pallas_src>
import functools

import jax
import jax.numpy as jnp
from jax.experimental import pallas as pl
from jax.experimental.pallas import tpu as pltpu

# Layer dims: encoder 87->150->150->90->50, decoder 50->90->150->150->87
LAYER_DIMS = [(87, 150), (150, 150), (150, 90), (90, 50),
              (50, 90), (90, 150), (150, 150), (150, 87)]
N_LAYERS = len(LAYER_DIMS)


def _round_up(x, m):
    return ((x + m - 1) // m) * m


def _pad_feature(d):
    # Pad sub-128 feature dims to a full lane tile; 150 stays (2 lane tiles).
    return _round_up(d, 128) if d < 128 else d


PADDED_DIMS = [(_pad_feature(i), _pad_feature(o)) for (i, o) in LAYER_DIMS]


def _mlp_kernel(x_ref, *refs):
    # refs = (w0, b0, w1, b1, ..., w7, b7, out_ref)
    out_ref = refs[-1]
    param_refs = refs[:-1]
    h = x_ref[...]                                   # f32 (TB, 128)
    for li in range(N_LAYERS):                       # static unroll
        w = param_refs[2 * li][...]                  # compute dtype (bf16)
        b = param_refs[2 * li + 1][...]              # f32 (1, out_pad)
        h = jnp.dot(h.astype(w.dtype), w,
                    preferred_element_type=jnp.float32) + b
        if li != N_LAYERS - 1:                       # ReLU except last layer
            h = jnp.maximum(h, 0.0)
    out_ref[...] = h.astype(out_ref.dtype)


def encoder_decoder_forward(x, params, *, block_b=256,
                            compute_dtype=jnp.bfloat16):
    """x: [B, 87] f32. params: list of (W[in,out] f32, b[1,out] f32)."""
    B, f_in = x.shape
    assert f_in == LAYER_DIMS[0][0]
    in_pad0 = PADDED_DIMS[0][0]
    out_pad_last = PADDED_DIMS[-1][1]
    out_feat = LAYER_DIMS[-1][1]

    # Batch tile: large for MXU utilization, but never bigger than needed.
    tb = min(block_b, _round_up(B, 8))
    b_pad = _round_up(B, tb)

    # Zero-pad input rows (batch) and columns (87 -> 128).
    x_pad = jnp.zeros((b_pad, in_pad0), jnp.float32).at[:B, :f_in].set(x)

    # Zero-pad weights/biases to padded feature dims (padding MUST be exactly
    # zero so padded lanes never leak through bias/ReLU into later layers).
    flat = []
    param_specs = []
    for (w, b), (ip, op) in zip(params, PADDED_DIMS):
        w_pad = (jnp.zeros((ip, op), compute_dtype)
                 .at[:w.shape[0], :w.shape[1]].set(w.astype(compute_dtype)))
        b_pad_arr = jnp.zeros((1, op), jnp.float32).at[:, :b.shape[1]].set(b)
        flat.extend([w_pad, b_pad_arr])
        # Same block every grid step -> weights stay VMEM-resident.
        param_specs.append(pl.BlockSpec((ip, op), lambda i: (0, 0)))
        param_specs.append(pl.BlockSpec((1, op), lambda i: (0, 0)))

    grid = (b_pad // tb,)
    x_spec = pl.BlockSpec((tb, in_pad0), lambda i: (i, 0))
    out_spec = pl.BlockSpec((tb, out_pad_last), lambda i: (i, 0))

    flops = 2 * b_pad * sum(ip * op for ip, op in PADDED_DIMS)
    bytes_accessed = (x_pad.size * 4
                      + sum(int(a.size) * a.dtype.itemsize for a in flat)
                      + b_pad * out_pad_last * 4)

    out = pl.pallas_call(
        _mlp_kernel,
        out_shape=jax.ShapeDtypeStruct((b_pad, out_pad_last), jnp.float32),
        grid=grid,
        in_specs=[x_spec] + param_specs,
        out_specs=out_spec,
        compiler_params=pltpu.CompilerParams(
            dimension_semantics=("parallel",),      # megacore on v7x
            vmem_limit_bytes=64 * 1024 * 1024,      # sized for v7x VMEM
        ),
        cost_estimate=pl.CostEstimate(
            flops=int(flops), transcendentals=0,
            bytes_accessed=int(bytes_accessed)),
    )(x_pad, *flat)

    return out[:B, :out_feat]


def init_params(key):
    """Deterministic init matching nn.Linear (uniform +/- 1/sqrt(fan_in)),
    with W stored already transposed to (in, out)."""
    params = []
    for (fan_in, fan_out) in LAYER_DIMS:
        key, kw, kb = jax.random.split(key, 3)
        bound = 1.0 / jnp.sqrt(fan_in)
        w = jax.random.uniform(kw, (fan_in, fan_out), jnp.float32, -bound, bound)
        b = jax.random.uniform(kb, (1, fan_out), jnp.float32, -bound, bound)
        params.append((w, b))
    return params


def reference_forward(x, params, compute_dtype=jnp.float32):
    """Pure-JAX reference. With compute_dtype=bf16 it follows the same
    mixed-precision path as the kernel (bf16 MXU operands, f32 accumulate)."""
    h = x
    for li, (w, b) in enumerate(params):
        h = jnp.dot(h.astype(compute_dtype), w.astype(compute_dtype),
                    preferred_element_type=jnp.float32) + b
        if li != N_LAYERS - 1:
            h = jnp.maximum(h, 0.0)
    return h


if __name__ == "__main__":
    key = jax.random.PRNGKey(0)
    key, kx = jax.random.split(key)
    B = 8
    x = jax.random.normal(kx, (B, 87), jnp.float32)

    params = init_params(key)

    out = encoder_decoder_forward(x, params)
    out = jax.block_until_ready(out)
    assert out.shape == (B, 87), out.shape

    # Matched-precision reference (bf16 operands, f32 accumulate).
    ref = reference_forward(x, params, compute_dtype=jnp.bfloat16)
    assert jnp.allclose(out, ref, atol=1e-2, rtol=1e-2), (
        "mismatch vs matched-precision reference")

    print("KERNEL_OK")
</pallas_src>

<mosaic_0001>
module attributes {stable_mosaic.version = 11 : i64} {
  func.func @_mlp_kernel(%arg0: i32, %arg1: memref<8x128xf32, #tpu.memory_space<vmem>>, %arg2: memref<128x150xbf16, #tpu.memory_space<vmem>>, %arg3: memref<1x150xf32, #tpu.memory_space<vmem>>, %arg4: memref<150x150xbf16, #tpu.memory_space<vmem>>, %arg5: memref<1x150xf32, #tpu.memory_space<vmem>>, %arg6: memref<150x128xbf16, #tpu.memory_space<vmem>>, %arg7: memref<1x128xf32, #tpu.memory_space<vmem>>, %arg8: memref<128x128xbf16, #tpu.memory_space<vmem>>, %arg9: memref<1x128xf32, #tpu.memory_space<vmem>>, %arg10: memref<128x128xbf16, #tpu.memory_space<vmem>>, %arg11: memref<1x128xf32, #tpu.memory_space<vmem>>, %arg12: memref<128x150xbf16, #tpu.memory_space<vmem>>, %arg13: memref<1x150xf32, #tpu.memory_space<vmem>>, %arg14: memref<150x150xbf16, #tpu.memory_space<vmem>>, %arg15: memref<1x150xf32, #tpu.memory_space<vmem>>, %arg16: memref<150x128xbf16, #tpu.memory_space<vmem>>, %arg17: memref<1x128xf32, #tpu.memory_space<vmem>>, %arg18: memref<8x128xf32, #tpu.memory_space<vmem>>) attributes {dimension_semantics = [#tpu.dimension_semantics<parallel>], iteration_bounds = array<i64: 1>, scalar_prefetch = 0 : i64, scratch_operands = 0 : i64, tpu.core_type = #tpu.core_type<tc>, window_params = [{transform_indices = @transform_0, window_bounds = array<i64: 8, 128>}, {pipeline_mode = #tpu.pipeline_mode<synchronous>, transform_indices = @transform_1, window_bounds = array<i64: 128, 150>}, {pipeline_mode = #tpu.pipeline_mode<synchronous>, transform_indices = @transform_2, window_bounds = array<i64: 1, 150>}, {pipeline_mode = #tpu.pipeline_mode<synchronous>, transform_indices = @transform_3, window_bounds = array<i64: 150, 150>}, {pipeline_mode = #tpu.pipeline_mode<synchronous>, transform_indices = @transform_4, window_bounds = array<i64: 1, 150>}, {pipeline_mode = #tpu.pipeline_mode<synchronous>, transform_indices = @transform_5, window_bounds = array<i64: 150, 128>}, {pipeline_mode = #tpu.pipeline_mode<synchronous>, transform_indices = @transform_6, window_bounds = array<i64: 1, 128>}, {pipeline_mode = #tpu.pipeline_mode<synchronous>, transform_indices = @transform_7, window_bounds = array<i64: 128, 128>}, {pipeline_mode = #tpu.pipeline_mode<synchronous>, transform_indices = @transform_8, window_bounds = array<i64: 1, 128>}, {pipeline_mode = #tpu.pipeline_mode<synchronous>, transform_indices = @transform_9, window_bounds = array<i64: 128, 128>}, {pipeline_mode = #tpu.pipeline_mode<synchronous>, transform_indices = @transform_10, window_bounds = array<i64: 1, 128>}, {pipeline_mode = #tpu.pipeline_mode<synchronous>, transform_indices = @transform_11, window_bounds = array<i64: 128, 150>}, {pipeline_mode = #tpu.pipeline_mode<synchronous>, transform_indices = @transform_12, window_bounds = array<i64: 1, 150>}, {pipeline_mode = #tpu.pipeline_mode<synchronous>, transform_indices = @transform_13, window_bounds = array<i64: 150, 150>}, {pipeline_mode = #tpu.pipeline_mode<synchronous>, transform_indices = @transform_14, window_bounds = array<i64: 1, 150>}, {pipeline_mode = #tpu.pipeline_mode<synchronous>, transform_indices = @transform_15, window_bounds = array<i64: 150, 128>}, {pipeline_mode = #tpu.pipeline_mode<synchronous>, transform_indices = @transform_16, window_bounds = array<i64: 1, 128>}, {transform_indices = @transform_17, window_bounds = array<i64: 8, 128>}]} {
    %c0 = arith.constant 0 : index
    %c0_0 = arith.constant 0 : index
    %0 = vector.load %arg1[%c0, %c0_0] : memref<8x128xf32, #tpu.memory_space<vmem>>, vector<8x128xf32>
    %c0_1 = arith.constant 0 : index
    %c0_2 = arith.constant 0 : index
    %1 = vector.load %arg2[%c0_1, %c0_2] : memref<128x150xbf16, #tpu.memory_space<vmem>>, vector<128x150xbf16>
    %c0_3 = arith.constant 0 : index
    %c0_4 = arith.constant 0 : index
    %2 = vector.load %arg3[%c0_3, %c0_4] : memref<1x150xf32, #tpu.memory_space<vmem>>, vector<1x150xf32>
    %3 = arith.truncf %0 : vector<8x128xf32> to vector<8x128xbf16>
    %cst = arith.constant dense<0.000000e+00> : vector<8x150xf32>
    %4 = tpu.matmul %3, %1, %cst {dimension_numbers = #tpu.dot_dimension_numbers<[1], [0], [0], [1], [0, 0, 1, 1], [], []>} : vector<8x128xbf16>, vector<128x150xbf16>, vector<8x150xf32> -> vector<8x150xf32>
    %5 = vector.broadcast %2 : vector<1x150xf32> to vector<8x150xf32>
    %6 = arith.addf %4, %5 : vector<8x150xf32>
    %cst_5 = arith.constant 0.000000e+00 : f32
    %7 = vector.broadcast %cst_5 : f32 to vector<8x150xf32>
    %8 = arith.maximumf %6, %7 : vector<8x150xf32>
    %c0_6 = arith.constant 0 : index
    %c0_7 = arith.constant 0 : index
    %9 = vector.load %arg4[%c0_6, %c0_7] : memref<150x150xbf16, #tpu.memory_space<vmem>>, vector<150x150xbf16>
    %c0_8 = arith.constant 0 : index
    %c0_9 = arith.constant 0 : index
    %10 = vector.load %arg5[%c0_8, %c0_9] : memref<1x150xf32, #tpu.memory_space<vmem>>, vector<1x150xf32>
    %11 = arith.truncf %8 : vector<8x150xf32> to vector<8x150xbf16>
    %cst_10 = arith.constant dense<0.000000e+00> : vector<8x150xf32>
    %12 = tpu.matmul %11, %9, %cst_10 {dimension_numbers = #tpu.dot_dimension_numbers<[1], [0], [0], [1], [0, 0, 1, 1], [], []>} : vector<8x150xbf16>, vector<150x150xbf16>, vector<8x150xf32> -> vector<8x150xf32>
    %13 = vector.broadcast %10 : vector<1x150xf32> to vector<8x150xf32>
    %14 = arith.addf %12, %13 : vector<8x150xf32>
    %cst_11 = arith.constant 0.000000e+00 : f32
    %15 = vector.broadcast %cst_11 : f32 to vector<8x150xf32>
    %16 = arith.maximumf %14, %15 : vector<8x150xf32>
    %c0_12 = arith.constant 0 : index
    %c0_13 = arith.constant 0 : index
    %17 = vector.load %arg6[%c0_12, %c0_13] : memref<150x128xbf16, #tpu.memory_space<vmem>>, vector<150x128xbf16>
    %c0_14 = arith.constant 0 : index
    %c0_15 = arith.constant 0 : index
    %18 = vector.load %arg7[%c0_14, %c0_15] : memref<1x128xf32, #tpu.memory_space<vmem>>, vector<1x128xf32>
    %19 = arith.truncf %16 : vector<8x150xf32> to vector<8x150xbf16>
    %cst_16 = arith.constant dense<0.000000e+00> : vector<8x128xf32>
    %20 = tpu.matmul %19, %17, %cst_16 {dimension_numbers = #tpu.dot_dimension_numbers<[1], [0], [0], [1], [0, 0, 1, 1], [], []>} : vector<8x150xbf16>, vector<150x128xbf16>, vector<8x128xf32> -> vector<8x128xf32>
    %21 = vector.broadcast %18 : vector<1x128xf32> to vector<8x128xf32>
    %22 = arith.addf %20, %21 : vector<8x128xf32>
    %cst_17 = arith.constant 0.000000e+00 : f32
    %23 = vector.broadcast %cst_17 : f32 to vector<8x128xf32>
    %24 = arith.maximumf %22, %23 : vector<8x128xf32>
    %c0_18 = arith.constant 0 : index
    %c0_19 = arith.constant 0 : index
    %25 = vector.load %arg8[%c0_18, %c0_19] : memref<128x128xbf16, #tpu.memory_space<vmem>>, vector<128x128xbf16>
    %c0_20 = arith.constant 0 : index
    %c0_21 = arith.constant 0 : index
    %26 = vector.load %arg9[%c0_20, %c0_21] : memref<1x128xf32, #tpu.memory_space<vmem>>, vector<1x128xf32>
    %27 = arith.truncf %24 : vector<8x128xf32> to vector<8x128xbf16>
    %cst_22 = arith.constant dense<0.000000e+00> : vector<8x128xf32>
    %28 = tpu.matmul %27, %25, %cst_22 {dimension_numbers = #tpu.dot_dimension_numbers<[1], [0], [0], [1], [0, 0, 1, 1], [], []>} : vector<8x128xbf16>, vector<128x128xbf16>, vector<8x128xf32> -> vector<8x128xf32>
    %29 = vector.broadcast %26 : vector<1x128xf32> to vector<8x128xf32>
    %30 = arith.addf %28, %29 : vector<8x128xf32>
    %cst_23 = arith.constant 0.000000e+00 : f32
    %31 = vector.broadcast %cst_23 : f32 to vector<8x128xf32>
    %32 = arith.maximumf %30, %31 : vector<8x128xf32>
    %c0_24 = arith.constant 0 : index
    %c0_25 = arith.constant 0 : index
    %33 = vector.load %arg10[%c0_24, %c0_25] : memref<128x128xbf16, #tpu.memory_space<vmem>>, vector<128x128xbf16>
    %c0_26 = arith.constant 0 : index
    %c0_27 = arith.constant 0 : index
    %34 = vector.load %arg11[%c0_26, %c0_27] : memref<1x128xf32, #tpu.memory_space<vmem>>, vector<1x128xf32>
    %35 = arith.truncf %32 : vector<8x128xf32> to vector<8x128xbf16>
    %cst_28 = arith.constant dense<0.000000e+00> : vector<8x128xf32>
    %36 = tpu.matmul %35, %33, %cst_28 {dimension_numbers = #tpu.dot_dimension_numbers<[1], [0], [0], [1], [0, 0, 1, 1], [], []>} : vector<8x128xbf16>, vector<128x128xbf16>, vector<8x128xf32> -> vector<8x128xf32>
    %37 = vector.broadcast %34 : vector<1x128xf32> to vector<8x128xf32>
    %38 = arith.addf %36, %37 : vector<8x128xf32>
    %cst_29 = arith.constant 0.000000e+00 : f32
    %39 = vector.broadcast %cst_29 : f32 to vector<8x128xf32>
    %40 = arith.maximumf %38, %39 : vector<8x128xf32>
    %c0_30 = arith.constant 0 : index
    %c0_31 = arith.constant 0 : index
    %41 = vector.load %arg12[%c0_30, %c0_31] : memref<128x150xbf16, #tpu.memory_space<vmem>>, vector<128x150xbf16>
    %c0_32 = arith.constant 0 : index
    %c0_33 = arith.constant 0 : index
    %42 = vector.load %arg13[%c0_32, %c0_33] : memref<1x150xf32, #tpu.memory_space<vmem>>, vector<1x150xf32>
    %43 = arith.truncf %40 : vector<8x128xf32> to vector<8x128xbf16>
    %cst_34 = arith.constant dense<0.000000e+00> : vector<8x150xf32>
    %44 = tpu.matmul %43, %41, %cst_34 {dimension_numbers = #tpu.dot_dimension_numbers<[1], [0], [0], [1], [0, 0, 1, 1], [], []>} : vector<8x128xbf16>, vector<128x150xbf16>, vector<8x150xf32> -> vector<8x150xf32>
    %45 = vector.broadcast %42 : vector<1x150xf32> to vector<8x150xf32>
    %46 = arith.addf %44, %45 : vector<8x150xf32>
    %cst_35 = arith.constant 0.000000e+00 : f32
    %47 = vector.broadcast %cst_35 : f32 to vector<8x150xf32>
    %48 = arith.maximumf %46, %47 : vector<8x150xf32>
    %c0_36 = arith.constant 0 : index
    %c0_37 = arith.constant 0 : index
    %49 = vector.load %arg14[%c0_36, %c0_37] : memref<150x150xbf16, #tpu.memory_space<vmem>>, vector<150x150xbf16>
    %c0_38 = arith.constant 0 : index
    %c0_39 = arith.constant 0 : index
    %50 = vector.load %arg15[%c0_38, %c0_39] : memref<1x150xf32, #tpu.memory_space<vmem>>, vector<1x150xf32>
    %51 = arith.truncf %48 : vector<8x150xf32> to vector<8x150xbf16>
    %cst_40 = arith.constant dense<0.000000e+00> : vector<8x150xf32>
    %52 = tpu.matmul %51, %49, %cst_40 {dimension_numbers = #tpu.dot_dimension_numbers<[1], [0], [0], [1], [0, 0, 1, 1], [], []>} : vector<8x150xbf16>, vector<150x150xbf16>, vector<8x150xf32> -> vector<8x150xf32>
    %53 = vector.broadcast %50 : vector<1x150xf32> to vector<8x150xf32>
    %54 = arith.addf %52, %53 : vector<8x150xf32>
    %cst_41 = arith.constant 0.000000e+00 : f32
    %55 = vector.broadcast %cst_41 : f32 to vector<8x150xf32>
    %56 = arith.maximumf %54, %55 : vector<8x150xf32>
    %c0_42 = arith.constant 0 : index
    %c0_43 = arith.constant 0 : index
    %57 = vector.load %arg16[%c0_42, %c0_43] : memref<150x128xbf16, #tpu.memory_space<vmem>>, vector<150x128xbf16>
    %c0_44 = arith.constant 0 : index
    %c0_45 = arith.constant 0 : index
    %58 = vector.load %arg17[%c0_44, %c0_45] : memref<1x128xf32, #tpu.memory_space<vmem>>, vector<1x128xf32>
    %59 = arith.truncf %56 : vector<8x150xf32> to vector<8x150xbf16>
    %cst_46 = arith.constant dense<0.000000e+00> : vector<8x128xf32>
    %60 = tpu.matmul %59, %57, %cst_46 {dimension_numbers = #tpu.dot_dimension_numbers<[1], [0], [0], [1], [0, 0, 1, 1], [], []>} : vector<8x150xbf16>, vector<150x128xbf16>, vector<8x128xf32> -> vector<8x128xf32>
    %61 = vector.broadcast %58 : vector<1x128xf32> to vector<8x128xf32>
    %62 = arith.addf %60, %61 : vector<8x128xf32>
    %c0_47 = arith.constant 0 : index
    %c0_48 = arith.constant 0 : index
    %63 = vector.load %arg18[%c0_47, %c0_48] : memref<8x128xf32, #tpu.memory_space<vmem>>, vector<8x128xf32>
    tpu.vector_store %arg18[%c0_47, %c0_48], %62 {strides = array<i32>} : memref<8x128xf32, #tpu.memory_space<vmem>>, vector<8x128xf32>,
    return
  }
  func.func @transform_0(%arg0: i32) -> (i32, i32) {
    %c0_i32 = arith.constant 0 : i32
    %c0_i32_0 = arith.constant 0 : i32
    return %arg0, %c0_i32 : i32, i32
  }
  func.func @transform_1(%arg0: i32) -> (i32, i32) {
    %c0_i32 = arith.constant 0 : i32
    %c0_i32_0 = arith.constant 0 : i32
    %c0_i32_1 = arith.constant 0 : i32
    return %c0_i32, %c0_i32_0 : i32, i32
  }
  func.func @transform_2(%arg0: i32) -> (i32, i32) {
    %c0_i32 = arith.constant 0 : i32
    %c0_i32_0 = arith.constant 0 : i32
    %c0_i32_1 = arith.constant 0 : i32
    return %c0_i32, %c0_i32_0 : i32, i32
  }
  func.func @transform_3(%arg0: i32) -> (i32, i32) {
    %c0_i32 = arith.constant 0 : i32
    %c0_i32_0 = arith.constant 0 : i32
    %c0_i32_1 = arith.constant 0 : i32
    return %c0_i32, %c0_i32_0 : i32, i32
  }
  func.func @transform_4(%arg0: i32) -> (i32, i32) {
    %c0_i32 = arith.constant 0 : i32
    %c0_i32_0 = arith.constant 0 : i32
    %c0_i32_1 = arith.constant 0 : i32
    return %c0_i32, %c0_i32_0 : i32, i32
  }
  func.func @transform_5(%arg0: i32) -> (i32, i32) {
    %c0_i32 = arith.constant 0 : i32
    %c0_i32_0 = arith.constant 0 : i32
    %c0_i32_1 = arith.constant 0 : i32
    return %c0_i32, %c0_i32_0 : i32, i32
  }
  func.func @transform_6(%arg0: i32) -> (i32, i32) {
    %c0_i32 = arith.constant 0 : i32
    %c0_i32_0 = arith.constant 0 : i32
    %c0_i32_1 = arith.constant 0 : i32
    return %c0_i32, %c0_i32_0 : i32, i32
  }
  func.func @transform_7(%arg0: i32) -> (i32, i32) {
    %c0_i32 = arith.constant 0 : i32
    %c0_i32_0 = arith.constant 0 : i32
    %c0_i32_1 = arith.constant 0 : i32
    return %c0_i32, %c0_i32_0 : i32, i32
  }
  func.func @transform_8(%arg0: i32) -> (i32, i32) {
    %c0_i32 = arith.constant 0 : i32
    %c0_i32_0 = arith.constant 0 : i32
    %c0_i32_1 = arith.constant 0 : i32
    return %c0_i32, %c0_i32_0 : i32, i32
  }
  func.func @transform_9(%arg0: i32) -> (i32, i32) {
    %c0_i32 = arith.constant 0 : i32
    %c0_i32_0 = arith.constant 0 : i32
    %c0_i32_1 = arith.constant 0 : i32
    return %c0_i32, %c0_i32_0 : i32, i32
  }
  func.func @transform_10(%arg0: i32) -> (i32, i32) {
    %c0_i32 = arith.constant 0 : i32
    %c0_i32_0 = arith.constant 0 : i32
    %c0_i32_1 = arith.constant 0 : i32
    return %c0_i32, %c0_i32_0 : i32, i32
  }
  func.func @transform_11(%arg0: i32) -> (i32, i32) {
    %c0_i32 = arith.constant 0 : i32
    %c0_i32_0 = arith.constant 0 : i32
    %c0_i32_1 = arith.constant 0 : i32
    return %c0_i32, %c0_i32_0 : i32, i32
  }
  func.func @transform_12(%arg0: i32) -> (i32, i32) {
    %c0_i32 = arith.constant 0 : i32
    %c0_i32_0 = arith.constant 0 : i32
    %c0_i32_1 = arith.constant 0 : i32
    return %c0_i32, %c0_i32_0 : i32, i32
  }
  func.func @transform_13(%arg0: i32) -> (i32, i32) {
    %c0_i32 = arith.constant 0 : i32
    %c0_i32_0 = arith.constant 0 : i32
    %c0_i32_1 = arith.constant 0 : i32
    return %c0_i32, %c0_i32_0 : i32, i32
  }
  func.func @transform_14(%arg0: i32) -> (i32, i32) {
    %c0_i32 = arith.constant 0 : i32
    %c0_i32_0 = arith.constant 0 : i32
    %c0_i32_1 = arith.constant 0 : i32
    return %c0_i32, %c0_i32_0 : i32, i32
  }
  func.func @transform_15(%arg0: i32) -> (i32, i32) {
    %c0_i32 = arith.constant 0 : i32
    %c0_i32_0 = arith.constant 0 : i32
    %c0_i32_1 = arith.constant 0 : i32
    return %c0_i32, %c0_i32_0 : i32, i32
  }
  func.func @transform_16(%arg0: i32) -> (i32, i32) {
    %c0_i32 = arith.constant 0 : i32
    %c0_i32_0 = arith.constant 0 : i32
    %c0_i32_1 = arith.constant 0 : i32
    return %c0_i32, %c0_i32_0 : i32, i32
  }
  func.func @transform_17(%arg0: i32) -> (i32, i32) {
    %c0_i32 = arith.constant 0 : i32
    %c0_i32_0 = arith.constant 0 : i32
    return %arg0, %c0_i32 : i32, i32
  }
}

</mosaic_0001>

<bundles_post_ra>
// kernel: tpu_custom_call.1
= control target key start
LH: loop header
LB: loop body
LE: loop exit
PB: predicated region body
PF: predicated region fallthrough
CT: control target
= control target key end

     0   :  { %s2149_s0 = inlined_call_operand.vmem [shape: f32[8,128], index: 0, kind: input, shape index: {}]   ;;  %s2150_s1 = inlined_call_operand.vmem [shape: bf16[128,150], index: 1, kind: input, shape index: {}]   ;;  %s2151_s2 = inlined_call_operand.vmem [shape: f32[1,150], index: 2, kind: input, shape index: {}]   ;;  %s2152_s3 = inlined_call_operand.vmem [shape: bf16[150,150], index: 3, kind: input, shape index: {}]   ;;  %s2153_s4 = inlined_call_operand.vmem [shape: f32[1,150], index: 4, kind: input, shape index: {}]   ;;  %s2154_s5 = inlined_call_operand.hbm [shape: bf16[150,128], index: 5, kind: input, shape index: {}]   ;;  %s2155_s6 = inlined_call_operand.vmem [shape: f32[1,128], index: 6, kind: input, shape index: {}]   ;;  %s2156_s7 = inlined_call_operand.hbm [shape: bf16[128,128], index: 7, kind: input, shape index: {}]   ;;  %s2157_s8 = inlined_call_operand.vmem [shape: f32[1,128], index: 8, kind: input, shape index: {}]   ;;  %s2158_s9 = inlined_call_operand.hbm [shape: bf16[128,128], index: 9, kind: input, shape index: {}]   ;;  %s2159_s10 = inlined_call_operand.vmem [shape: f32[1,128], index: 10, kind: input, shape index: {}]   ;;  %s2160_s11 = inlined_call_operand.vmem [shape: bf16[128,150], index: 11, kind: input, shape index: {}]   ;;  %s2161_s12 = inlined_call_operand.vmem [shape: f32[1,150], index: 12, kind: input, shape index: {}]   ;;  %s2162_s13 = inlined_call_operand.vmem [shape: bf16[150,150], index: 13, kind: input, shape index: {}]   ;;  %s2163_s14 = inlined_call_operand.vmem [shape: f32[1,150], index: 14, kind: input, shape index: {}]   ;;  %s2164_s15 = inlined_call_operand.hbm [shape: bf16[150,128], index: 15, kind: input, shape index: {}]   ;;  %s2165_s16 = inlined_call_operand.vmem [shape: f32[1,128], index: 16, kind: input, shape index: {}]   ;;  %s2166_s17 = inlined_call_operand.hbm [shape: f32[8,128], index: 17, kind: output, shape index: {}]  }
   0x1   :  { %2168 = sst [smem:[#allocation15_spill]] %s2149_s0 }
   0x2   :  { %2169 = sst [smem:[#allocation16_spill]] %s2150_s1 }
   0x3   :  { %22 = vsyncpa [#allocation3], 0 }
   0x4   :  { %23 = vsyncpa [#allocation6], 0 }
   0x5   :  { %24 = vsyncpa [#allocation9], 0 }
   0x6   :  { %25 = vsyncpa [#allocation4], 0  ;;  %s1723_s24 = smov [#allocation5]   ;;  %s1724_s26 = smov [#allocation2]  }
   0x7   :  { %s55_s25 = sshll.u32 %s1723_s24, 4  ;;  %s41_s27 = sshll.u32 %s1724_s26, 4  ;;  %s56_s25 = int_to_ptr.vmem [resolvable:$true] %s55_s25  ;;  %s42_s27 = int_to_ptr.vmem [resolvable:$true] %s41_s27 }
   0x8   :  { %s1623_s28 = scalar_lea.vmem %s56_s25, 1024  ;;  %p1628_p1 = scmp.lt.s32.totalorder %s56_s25, %s56_s25 }
   0x9   :  { %p1624_p0 = scmp.ne.s32.totalorder %s56_s25, %s1623_s28  ;;  %p1629_p2 = scmp.lt.s32.totalorder %s1623_s28, %s1623_s28 }
   0xb   :  { %p1630_p3 = por %p1629_p2, %p1628_p1 }
   0xd   :  { %p1631_p4 = pnand %p1630_p3, %p1624_p0 }
   0xf   :  { %1634 = shalt.err (!%p1631_p4)
}
  0x10   :  { %s1725_s29 = smov 64   ;;  %s1726_s0 = smov 4  }
  0x11   :  { %61 = dma.hbm_to_vmem [thread:$0]  %s2156_s7, 1024, %s56_s25, [#allocation6], %s1725_s29, %s1725_s29, %s1726_s0  }
  0x12   :  { %s1643_s19 = scalar_lea.vmem %s42_s27, 1216  ;;  %p1648_p6 = scmp.lt.s32.totalorder %s42_s27, %s42_s27 }
  0x13   :  { %p1644_p5 = scmp.ne.s32.totalorder %s42_s27, %s1643_s19  ;;  %p1649_p7 = scmp.lt.s32.totalorder %s1643_s19, %s1643_s19 }
  0x15   :  { %p1650_p8 = por %p1649_p7, %p1648_p6 }
  0x17   :  { %p1651_p9 = pnand %p1650_p8, %p1644_p5 }
  0x19   :  { %1654 = shalt.err (!%p1651_p9)
}
  0x1a   :  { %47 = dma.hbm_to_vmem [thread:$0]  %s2154_s5, 1216, %s42_s27, [#allocation3], %s1725_s29, %s1725_s29, %s1726_s0  }
  0x1b   :  { %s1727_s21 = smov [#allocation7]   ;;  %s1728_s23 = smov [#allocation8]  }
  0x1c   :  { %s69_s22 = sshll.u32 %s1727_s21, 4  ;;  %s91_s24 = sshll.u32 %s1728_s23, 4  ;;  %s70_s22 = int_to_ptr.vmem [resolvable:$true] %s69_s22  ;;  %s92_s24 = int_to_ptr.vmem [resolvable:$true] %s91_s24 }
  0x1d   :  { %s1663_s7 = scalar_lea.vmem %s70_s22, 1024  ;;  %p1668_p11 = scmp.lt.s32.totalorder %s70_s22, %s70_s22 }
  0x1e   :  { %p1664_p10 = scmp.ne.s32.totalorder %s70_s22, %s1663_s7  ;;  %p1669_p12 = scmp.lt.s32.totalorder %s1663_s7, %s1663_s7 }
  0x20   :  { %p1670_p13 = por %p1669_p12, %p1668_p11 }
  0x22   :  { %p1671_p0 = pnand %p1670_p13, %p1664_p10 }
  0x24   :  { %1674 = shalt.err (!%p1671_p0)
}
  0x25   :  { %75 = dma.hbm_to_vmem [thread:$0]  %s2158_s9, 1024, %s70_s22, [#allocation6], %s1725_s29, %s1725_s29, %s1726_s0  }
  0x26   :  { %s1683_s5 = scalar_lea.vmem %s92_s24, 1216  ;;  %p1688_p2 = scmp.lt.s32.totalorder %s92_s24, %s92_s24 }
  0x27   :  { %p1684_p1 = scmp.ne.s32.totalorder %s92_s24, %s1683_s5  ;;  %p1689_p3 = scmp.lt.s32.totalorder %s1683_s5, %s1683_s5 }
  0x29   :  { %p1690_p4 = por %p1689_p3, %p1688_p2 }
  0x2b   :  { %p1691_p5 = pnand %p1690_p4, %p1684_p1 }
  0x2d   :  { %1694 = shalt.err (!%p1691_p5)
}
  0x2e   :  { %97 = dma.hbm_to_vmem [thread:$0]  %s2164_s15, 1216, %s92_s24, [#allocation9], %s1725_s29, %s1725_s29, %s1726_s0  }
  0x2f   :  { %1715 = dma.done.wait [#allocation3], 1216  }
  0x30   :  { %1716 = vsyncadd [#allocation3], 4294966080 }
  0x31   :  { %1717 = dma.done.wait [#allocation6], 2048  }
  0x32   :  { %1718 = vsyncadd [#allocation6], 4294965248 }
  0x33   :  { %1719 = dma.done.wait [#allocation9], 1216  }
  0x34   :  { %1720 = vsyncadd [#allocation9], 4294966080  ;;  %v1729_v0 = vmov 0   ;;  %s2170_s18 = sld [smem:[#allocation16_spill]]  ;;  %v1497_v10 = vld [vmem:[%s2152_s3 + $0x74] ss:$8 sps:$4 sm:$0xff]   ;;  %v133_v49 = vlaneseq }
  0x35   :  { %255 = vmatprep.mubr.bf16.mxu0 %v1729_v0  ;;  %v1499_v11 = vld [vmem:[%s2152_s3 + $0x70] ss:$8 sps:$4 sm:$0xff]   ;;  %405 = vmatprep.subr.bf16.mxu1 %v1497_v10  ;;  %v1500_v12 = vld [vmem:[%s2152_s3 + $0x64] ss:$8 sps:$4 sm:$0xff]   ;;  %v1502_v14 = vld [vmem:[%s2152_s3 + $0x60] ss:$8 sps:$4 sm:$0xff]  }
  0x36   :  { %406 = vmatpush1.bf16.msra.mxu1 %v1499_v11  ;;  %v1503_v15 = vld [vmem:[%s2152_s3 + $0x54] ss:$8 sps:$4 sm:$0xff]   ;;  %v1505_v18 = vld [vmem:[%s2152_s3 + $0x50] ss:$8 sps:$4 sm:$0xff]   ;;  %v1506_v19 = vld [vmem:[%s2152_s3 + $0x44] ss:$8 sps:$4 sm:$0xff]  }
  0x37   :  { %407 = vmatprep.subr.bf16.mxu1 %v1500_v12  ;;  %v1508_v22 = vld [vmem:[%s2152_s3 + $0x40] ss:$8 sps:$4 sm:$0xff]   ;;  %v1509_v23 = vld [vmem:[%s2152_s3 + $0x34] ss:$8 sps:$4 sm:$0xff]   ;;  %v1511_v25 = vld [vmem:[%s2152_s3 + $0x30] ss:$8 sps:$4 sm:$0xff]  }
  0x38   :  { %s2171_s9 = sld [smem:[#allocation15_spill]]  ;;  %v1512_v28 = vld [vmem:[%s2152_s3 + $0x24] ss:$8 sps:$4 sm:$0xff]   ;;  %v1514_v29 = vld [vmem:[%s2152_s3 + $0x20] ss:$8 sps:$4 sm:$0xff]   ;;  %vm398_vm0 = vcmask 1042432  }
  0x39   :  { %v1515_v30 = vld [vmem:[%s2152_s3 + $0x14] ss:$8 sps:$4 sm:$0xff]   ;;  %v1517_v32 = vld [vmem:[%s2152_s3 + $0x10] ss:$8 sps:$4 sm:$0xff]   ;;  %v1518_v33 = vld [vmem:[%s2152_s3 + $0x4] ss:$8 sps:$4 sm:$0xff]  }
  0x3a   :  { %v1473_v1 = vld [vmem:[%s2170_s18 + $0x74] ss:$8 sps:$4 sm:$0xff]   ;;  %v1475_v2 = vld [vmem:[%s2170_s18 + $0x70] ss:$8 sps:$4 sm:$0xff]   ;;  %v1476_v3 = vld [vmem:[%s2170_s18 + $0x64] ss:$8 sps:$4 sm:$0xff]   ;;  %408 = vmatpush1.bf16.msra.mxu1 %v1502_v14 }
  0x3b   :  { %223 = vmatprep.subr.bf16.mxu0 %v1473_v1  ;;  %v1478_v4 = vld [vmem:[%s2170_s18 + $0x60] ss:$8 sps:$4 sm:$0xff]   ;;  %v1479_v5 = vld [vmem:[%s2170_s18 + $0x54] ss:$8 sps:$4 sm:$0xff]   ;;  %v1481_v6 = vld [vmem:[%s2170_s18 + $0x50] ss:$8 sps:$4 sm:$0xff]   ;;  %409 = vmatprep.subr.bf16.mxu1 %v1503_v15 }
  0x3c   :  { %224 = vmatpush1.bf16.msra.mxu0 %v1475_v2  ;;  %v1482_v7 = vld [vmem:[%s2170_s18 + $0x44] ss:$8 sps:$4 sm:$0xff]   ;;  %v1484_v8 = vld [vmem:[%s2170_s18 + $0x40] ss:$8 sps:$4 sm:$0xff]   ;;  %v1485_v9 = vld [vmem:[%s2170_s18 + $0x34] ss:$8 sps:$4 sm:$0xff]  }
  0x3d   :  { %225 = vmatprep.subr.bf16.mxu0 %v1476_v3  ;;  %v1487_v13 = vld [vmem:[%s2170_s18 + $0x30] ss:$8 sps:$4 sm:$0xff]   ;;  %v1488_v16 = vld [vmem:[%s2170_s18 + $0x24] ss:$8 sps:$4 sm:$0xff]   ;;  %v1490_v17 = vld [vmem:[%s2170_s18 + $0x20] ss:$8 sps:$4 sm:$0xff]  }
  0x3e   :  { %v1491_v20 = vld [vmem:[%s2170_s18 + $0x14] ss:$8 sps:$4 sm:$0xff]   ;;  %v1493_v21 = vld [vmem:[%s2170_s18 + $0x10] ss:$8 sps:$4 sm:$0xff]   ;;  %v1494_v24 = vld [vmem:[%s2170_s18 + $0x4] ss:$8 sps:$4 sm:$0xff]   ;;  %410 = vmatpush1.bf16.msra.mxu1 %v1505_v18 }
  0x3f   :  { %411 = vmatprep.subr.bf16.mxu1 %v1506_v19  ;;  %v1496_v26 = vld [vmem:[%s2170_s18] ss:$8 sps:$4 sm:$0xff]   ;;  %v284_v35 = vld [vmem:[%s2152_s3 + $0x90] sm:$0x77]  ;;  %v1523_v39 = vld [vmem:[%s2152_s3 + $0x84] ss:$8 sps:$4 sm:$0xff]  }
  0x40   :  { %226 = vmatpush1.bf16.msra.mxu0 %v1478_v4  ;;  %v113_v27 = vld [vmem:[%s2171_s9] sm:$0xff]  ;;  %v1322_v36 = vcombine.high %v284_v35, %v284_v35  ;;  %v1321_v37 = vcombine.low %v284_v35, %v284_v35  ;;  %v1526_v41 = vld [vmem:[#allocation2 + $0x38] sm:$0xff]   ;;  %v1527_v42 = vld [vmem:[#allocation2 + $0x30] sm:$0xff]   ;;  %v134_v50 = vshrl.u32 %v133_v49, 7  ;;  %vm394_vm1 = vcmask 179200  }
  0x41   :  { %227 = vmatprep.subr.bf16.mxu0 %v1479_v5  ;;  %v131_v31 = vpack.c.bf16 %v113_v27, %v113_v27  ;;  %v1520_v34 = vld [vmem:[%s2152_s3] ss:$8 sps:$4 sm:$0xff]   ;;  %v1530_v45 = vld [vmem:[#allocation2 + $0x18] sm:$0xff]   ;;  %v1531_v46 = vld [vmem:[#allocation2 + $0x10] sm:$0xff]   ;;  %vm1731_vm2 = vmmov 0  }
  0x42   :  { %412 = vmatpush1.bf16.msra.mxu1 %v1508_v22  ;;  %v400_v38 = vsel %vm398_vm0, %v1321_v37, 0  ;;  %v1525_v40 = vld [vmem:[%s2152_s3 + $0x80] ss:$8 sps:$4 sm:$0xff]   ;;  %v1967_v51 = vsub.s32 0, %v134_v50  ;;  %v1972_v53 = vsub.s32 1, %v134_v50  ;;  %v1539_v10 = vld [vmem:[#allocation5 + $0x20] sm:$0xff]  }
  0x43   :  { %413 = vmatprep.subr.bf16.mxu1 %v1509_v23  ;;  %v1528_v43 = vld [vmem:[#allocation2 + $0x28] sm:$0xff]   ;;  %v1529_v44 = vld [vmem:[#allocation2 + $0x20] sm:$0xff]   ;;  %v1558_v49 = vld [vmem:[%s2160_s11 + $0x50] ss:$8 sps:$4 sm:$0xff]  }
  0x44   :  { %228 = vmatpush1.bf16.msra.mxu0 %v1481_v6  ;;  %v1532_v47 = vld [vmem:[#allocation2 + $0x8] sm:$0xff]   ;;  %v1533_v48 = vld [vmem:[#allocation2] sm:$0xff]  }
  0x45   :  { %229 = vmatprep.subr.bf16.mxu0 %v1482_v7  ;;  %v130_v52 = vld [vmem:[%s2151_s2] sm:$0x3]  ;;  %v1534_v3 = vld [vmem:[#allocation2 + $0x48] ss:$0 sps:$4 sm:$0x77]   ;;  %v1730_v7 = vmov 0.0  }
  0x46   :  { %414 = vmatpush1.bf16.msra.mxu1 %v1511_v25  ;;  %v136_v54 = vrot.slane %v130_v52, %v1967_v51  ;;  %v140_v55 = vrot.slane %v130_v52, %v1972_v53  ;;  %v537_v4 = vsel %vm398_vm0, %v1534_v3, 0  ;;  %v1535_v5 = vld [vmem:[#allocation2 + $0x40] sm:$0xff]   ;;  %v1543_v27 = vld [vmem:[#allocation5] sm:$0xff]  }
  0x47   :  { %415 = vmatprep.subr.bf16.mxu1 %v1512_v28  ;;  %v1536_v6 = vld [vmem:[#allocation5 + $0x38] sm:$0xff]   ;;  %v1541_v12 = vld [vmem:[#allocation5 + $0x10] sm:$0xff]  }
  0x48   :  { %230 = vmatpush1.bf16.msra.mxu0 %v1484_v8  ;;  %v1537_v8 = vld [vmem:[#allocation5 + $0x30] sm:$0xff]   ;;  %v1540_v11 = vld [vmem:[#allocation5 + $0x18] sm:$0xff]  }
  0x49   :  { %231 = vmatprep.subr.bf16.mxu0 %v1485_v9  ;;  %v1538_v9 = vld [vmem:[#allocation5 + $0x28] sm:$0xff]   ;;  %v1544_v28 = vld [vmem:[#allocation7 + $0x38] sm:$0xff]  }
  0x4a   :  { %416 = vmatpush1.bf16.msra.mxu1 %v1514_v29  ;;  %v1545_v29 = vld [vmem:[#allocation7 + $0x30] sm:$0xff]   ;;  %v1563_v50 = vld [vmem:[%s2160_s11 + $0x44] ss:$8 sps:$4 sm:$0xff]  }
  0x4b   :  { %417 = vmatprep.subr.bf16.mxu1 %v1515_v30  ;;  %v1546_v30 = vld [vmem:[#allocation7 + $0x28] sm:$0xff]   ;;  %v1561_v52 = vld [vmem:[%s2160_s11 + $0x40] ss:$8 sps:$4 sm:$0xff]  }
  0x4c   :  { %232 = vmatpush1.bf16.msra.mxu0 %v1487_v13  ;;  %v285_v13 = vld [vmem:[%s2153_s4] sm:$0x3] }
  0x4d   :  { %233 = vmatprep.subr.bf16.mxu0 %v1488_v16  ;;  %v292_v14 = vrot.slane %v285_v13, %v1967_v51  ;;  %v296_v15 = vrot.slane %v285_v13, %v1972_v53  ;;  %v1587_v13 = vld [vmem:[%s2162_s13 + $0x44] ss:$8 sps:$4 sm:$0xff]  }
  0x4e   :  { %418 = vmatpush1.bf16.msra.mxu1 %v1517_v32  ;;  %v1548_v32 = vld [vmem:[#allocation7 + $0x18] sm:$0xff]  }
  0x4f   :  { %419 = vmatprep.subr.bf16.mxu1 %v1518_v33  ;;  %v1549_v33 = vld [vmem:[#allocation7 + $0x10] sm:$0xff]  }
  0x50   :  { %234 = vmatpush1.bf16.msra.mxu0 %v1490_v17 }
  0x51   :  { %235 = vmatprep.subr.bf16.mxu0 %v1491_v20 }
  0x52   :  { %420 = vmatpush1.bf16.msra.mxu1 %v1520_v34  ;;  %v1325_v34 = vld [vmem:[%s2155_s6] ss:$0 sm:$0xff] }
  0x53   :  { %1323 = vmatprep.subr.msk.bf16.mxu1 %vm398_vm0, %v1322_v36 }
  0x54   :  { %236 = vmatpush1.bf16.msra.mxu0 %v1493_v21 }
  0x55   :  { %237 = vmatprep.subr.bf16.mxu0 %v1494_v24 }
  0x56   :  { %434 = vmatpush2.bf16.msra.mxu1 %v400_v38 }
  0x57   :  { %435 = vmatprep.subr.bf16.mxu1 %v1523_v39 }
  0x58   :  { %238 = vmatpush1.bf16.msra.mxu0 %v1496_v26  ;;  %v1542_v26 = vld [vmem:[#allocation5 + $0x8] sm:$0xff]  }
  0x59   :  { %539 = vmatprep.subr.bf16.mxu0 %v1729_v0 }
  0x5a   :  { %436 = vmatpush2.bf16.msra.mxu1 %v1525_v40 }
  0x5b   :  { %256 = vmatmul.mubr.bf16.vlgmr.msra.gmra.mxu0 %v131_v31  ;;  %1423 = vmatprep.subr.bf16.mxu1 %v1730_v7  ;;  %v1547_v31 = vld [vmem:[#allocation7 + $0x20] sm:$0xff]  }
  0x5c   :  { %540 = vmatpush1.bf16.msra.mxu0 %v1526_v41 }
  0x5d   :  { %541 = vmatprep.subr.bf16.mxu0 %v1729_v0 }
  0x60   :  { %542 = vmatpush1.bf16.msra.mxu0 %v1527_v42  ;;  %v1550_v42 = vld [vmem:[#allocation7 + $0x8] sm:$0xff]  }
  0x61   :  { %543 = vmatprep.subr.bf16.mxu0 %v1729_v0 }
  0x64   :  { %544 = vmatpush1.bf16.msra.mxu0 %v1528_v43  ;;  %v1551_v43 = vld [vmem:[#allocation7] sm:$0xff]  }
  0x65   :  { %545 = vmatprep.subr.bf16.mxu0 %v1729_v0 }
  0x68   :  { %546 = vmatpush1.bf16.msra.mxu0 %v1529_v44  ;;  %v1552_v44 = vld [vmem:[%s2160_s11 + $0x70] ss:$8 sps:$4 sm:$0xff]  }
  0x69   :  { %547 = vmatprep.subr.bf16.mxu0 %v1729_v0 }
  0x6c   :  { %548 = vmatpush1.bf16.msra.mxu0 %v1530_v45  ;;  %v1554_v45 = vld [vmem:[%s2160_s11 + $0x74] ss:$8 sps:$4 sm:$0xff]  }
  0x6d   :  { %549 = vmatprep.subr.bf16.mxu0 %v1729_v0 }
  0x70   :  { %550 = vmatpush1.bf16.msra.mxu0 %v1531_v46  ;;  %v1557_v46 = vld [vmem:[%s2160_s11 + $0x64] ss:$8 sps:$4 sm:$0xff]  }
  0x71   :  { %551 = vmatprep.subr.bf16.mxu0 %v1729_v0 }
  0x74   :  { %552 = vmatpush1.bf16.msra.mxu0 %v1532_v47  ;;  %v1555_v47 = vld [vmem:[%s2160_s11 + $0x60] ss:$8 sps:$4 sm:$0xff]  }
  0x75   :  { %553 = vmatprep.subr.bf16.mxu0 %v1729_v0 }
  0x78   :  { %554 = vmatpush1.bf16.msra.mxu0 %v1533_v48  ;;  %v1560_v48 = vld [vmem:[%s2160_s11 + $0x54] ss:$8 sps:$4 sm:$0xff]  }
  0x79   :  { %567 = vmatprep.subr.bf16.mxu0 %v1729_v0 }
  0x7c   :  { %568 = vmatpush2.bf16.msra.mxu0 %v537_v4 }
  0x7d   :  { %569 = vmatprep.subr.bf16.mxu0 %v1729_v0 }
  0x80   :  { %570 = vmatpush2.bf16.msra.mxu0 %v1535_v5  ;;  %v1575_v5 = vld [vmem:[%s2160_s11 + $0x4] ss:$8 sps:$4 sm:$0xff]  }
  0x81   :  { %1443 = vmatprep.subr.bf16.mxu0 %v1730_v7 }
 0x11b   :  { %v257_v56 = vpop.f32.mrf.mxu0 }
 0x11c   :  { %v258_v57 = vadd.f32 %v257_v56, %v136_v54  ;;  %v1566_v54 = vld [vmem:[%s2160_s11 + $0x34] ss:$8 sps:$4 sm:$0xff]   ;;  %v1569_v56 = vld [vmem:[%s2160_s11 + $0x24] ss:$8 sps:$4 sm:$0xff]  }
 0x11d   :  { %v259_v58 = vpop.f32.mrf.mxu0 }
 0x11e   :  { %v260_v59 = vadd.f32 %v259_v58, %v140_v55  ;;  %v264_v60 = vmax.f32 %v258_v57, 0.0  ;;  %v1564_v55 = vld [vmem:[%s2160_s11 + $0x30] ss:$8 sps:$4 sm:$0xff]   ;;  %v1567_v57 = vld [vmem:[%s2160_s11 + $0x20] ss:$8 sps:$4 sm:$0xff]  }
 0x11f   :  { %v261_v61 = vpop.f32.mrf.mxu0  ;;  %v1572_v58 = vld [vmem:[%s2160_s11 + $0x14] ss:$8 sps:$4 sm:$0xff]  }
 0x120   :  { %v265_v62 = vmax.f32 %v260_v59, 0.0  ;;  %v286_v2 = vpack.c.bf16 %v264_v60, %v264_v60  ;;  %v1570_v59 = vld [vmem:[%s2160_s11 + $0x10] ss:$8 sps:$4 sm:$0xff]   ;;  %v1337_v60 = vld [vmem:[%s2157_s8] ss:$0 sm:$0xff] }
 0x121   :  { %v262_v63 = vpop.f32.mrf.mxu0 }
 0x122   :  { %v287_v1 = vpack.c.bf16 %v265_v62, %v265_v62 }
 0x124   :  { %1324 = vmatprep.mubr.msk.bf16.mxu1 %vm394_vm1, %v287_v1 }
 0x125   :  { %438 = vmatmul.mubr.bf16.vlgmr.msra.gmra.mxu1 %v286_v2 }
 0x126   :  { %1424 = vmatpush3.bf16.msra.mxu1 %v1536_v6  ;;  %1439 = vmatprep.mubr.msk.bf16.mxu1 %vm1731_vm2, %v1730_v7  ;;  %v1573_v6 = vld [vmem:[%s2160_s11] ss:$8 sps:$4 sm:$0xff]  }
 0x127   :  { %1425 = vmatprep.subr.bf16.mxu1 %v1730_v7 }
 0x12a   :  { %1426 = vmatpush3.bf16.msra.mxu1 %v1537_v8  ;;  %v1578_v8 = vld [vmem:[%s2162_s13 + $0x74] ss:$8 sps:$4 sm:$0xff]  }
 0x12b   :  { %1427 = vmatprep.subr.bf16.mxu1 %v1730_v7 }
 0x12e   :  { %1428 = vmatpush3.bf16.msra.mxu1 %v1538_v9  ;;  %v1581_v9 = vld [vmem:[%s2162_s13 + $0x64] ss:$8 sps:$4 sm:$0xff]  }
 0x12f   :  { %1429 = vmatprep.subr.bf16.mxu1 %v1730_v7 }
 0x132   :  { %1430 = vmatpush3.bf16.msra.mxu1 %v1539_v10  ;;  %v1579_v10 = vld [vmem:[%s2162_s13 + $0x60] ss:$8 sps:$4 sm:$0xff]  }
 0x133   :  { %1431 = vmatprep.subr.bf16.mxu1 %v1730_v7 }
 0x136   :  { %1432 = vmatpush3.bf16.msra.mxu1 %v1540_v11  ;;  %v1584_v11 = vld [vmem:[%s2162_s13 + $0x54] ss:$8 sps:$4 sm:$0xff]  }
 0x137   :  { %1433 = vmatprep.subr.bf16.mxu1 %v1730_v7 }
 0x13a   :  { %1434 = vmatpush3.bf16.msra.mxu1 %v1541_v12  ;;  %v1582_v12 = vld [vmem:[%s2162_s13 + $0x50] ss:$8 sps:$4 sm:$0xff]  }
 0x13b   :  { %1435 = vmatprep.subr.bf16.mxu1 %v1730_v7 }
 0x13e   :  { %1436 = vmatpush3.bf16.msra.mxu1 %v1542_v26 }
 0x13f   :  { %1437 = vmatprep.subr.bf16.mxu1 %v1730_v7 }
 0x142   :  { %1438 = vmatpush3.bf16.msra.mxu1 %v1543_v27 }
 0x143   :  { %915 = vmatprep.subr.bf16.mxu1 %v1554_v45  ;;  %v822_v45 = vld [vmem:[%s2161_s12] sm:$0x3] }
 0x1e5   :  { %v439_v16 = vpop.f32.mrf.mxu1 }
 0x1e6   :  { %v440_v17 = vadd.f32 %v439_v16, %v292_v14  ;;  %v1585_v14 = vld [vmem:[%s2162_s13 + $0x40] ss:$8 sps:$4 sm:$0xff]   ;;  %v1588_v16 = vld [vmem:[%s2162_s13 + $0x30] ss:$8 sps:$4 sm:$0xff]  }
 0x1e7   :  { %v441_v18 = vpop.f32.mrf.mxu1 }
 0x1e8   :  { %v442_v19 = vadd.f32 %v441_v18, %v296_v15  ;;  %v446_v20 = vmax.f32 %v440_v17, 0.0  ;;  %v1590_v15 = vld [vmem:[%s2162_s13 + $0x34] ss:$8 sps:$4 sm:$0xff]   ;;  %v1593_v17 = vld [vmem:[%s2162_s13 + $0x24] ss:$8 sps:$4 sm:$0xff]  }
 0x1e9   :  { %v443_v21 = vpop.f32.mrf.mxu1  ;;  %v1591_v18 = vld [vmem:[%s2162_s13 + $0x20] ss:$8 sps:$4 sm:$0xff]  }
 0x1ea   :  { %v447_v22 = vmax.f32 %v442_v19, 0.0  ;;  %v468_v25 = vpack.c.bf16 %v446_v20, %v446_v20  ;;  %v1596_v19 = vld [vmem:[%s2162_s13 + $0x14] ss:$8 sps:$4 sm:$0xff]   ;;  %v1594_v20 = vld [vmem:[%s2162_s13 + $0x10] ss:$8 sps:$4 sm:$0xff]  }
 0x1eb   :  { %v444_v23 = vpop.f32.mrf.mxu1  ;;  %v1599_v21 = vld [vmem:[%s2162_s13 + $0x4] ss:$8 sps:$4 sm:$0xff]  }
 0x1ec   :  { %v469_v24 = vpack.c.bf16 %v447_v22, %v447_v22  ;;  %v1597_v22 = vld [vmem:[%s2162_s13] ss:$8 sps:$4 sm:$0xff]  }
 0x1ed   :  { %v1346_v23 = vld [vmem:[%s2159_s10] ss:$0 sm:$0xff] }
 0x1ee   :  { %1336 = vmatprep.mubr.msk.bf16.mxu0 %vm394_vm1, %v469_v24 }
 0x1ef   :  { %572 = vmatmul.mubr.bf16.vlgmr.msra.gmra.mxu0 %v468_v25 }
 0x1f0   :  { %1459 = vmatprep.mubr.msk.bf16.mxu0 %vm1731_vm2, %v1730_v7  ;;  %1444 = vmatpush3.bf16.msra.mxu0 %v1544_v28 }
 0x1f1   :  { %1445 = vmatprep.subr.bf16.mxu0 %v1730_v7 }
 0x1f4   :  { %1446 = vmatpush3.bf16.msra.mxu0 %v1545_v29 }
 0x1f5   :  { %1447 = vmatprep.subr.bf16.mxu0 %v1730_v7 }
 0x1f8   :  { %1448 = vmatpush3.bf16.msra.mxu0 %v1546_v30 }
 0x1f9   :  { %1449 = vmatprep.subr.bf16.mxu0 %v1730_v7 }
 0x1fc   :  { %1450 = vmatpush3.bf16.msra.mxu0 %v1547_v31  ;;  %v976_v31 = vld [vmem:[%s2162_s13 + $0x90] sm:$0x77] }
 0x1fd   :  { %1451 = vmatprep.subr.bf16.mxu0 %v1730_v7 }
 0x200   :  { %1452 = vmatpush3.bf16.msra.mxu0 %v1548_v32  ;;  %v1390_v32 = vcombine.high %v976_v31, %v976_v31 }
 0x201   :  { %1453 = vmatprep.subr.bf16.mxu0 %v1730_v7 }
 0x204   :  { %1454 = vmatpush3.bf16.msra.mxu0 %v1549_v33  ;;  %v1389_v33 = vcombine.low %v976_v31, %v976_v31 }
 0x205   :  { %1455 = vmatprep.subr.bf16.mxu0 %v1730_v7 }
 0x208   :  { %1456 = vmatpush3.bf16.msra.mxu0 %v1550_v42  ;;  %v1610_v42 = vld [vmem:[#allocation8 + $0x10] sm:$0xff]  }
 0x209   :  { %1457 = vmatprep.subr.bf16.mxu0 %v1730_v7  ;;  %v1576_v7 = vld [vmem:[%s2162_s13 + $0x70] ss:$8 sps:$4 sm:$0xff]  }
 0x20c   :  { %1458 = vmatpush3.bf16.msra.mxu0 %v1551_v43  ;;  %v1611_v43 = vld [vmem:[#allocation8 + $0x8] sm:$0xff]  }
 0x20d   :  { %1095 = vmatprep.subr.bf16.mxu0 %v1578_v8 }
 0x2af   :  { %v573_v35 = vpop.f32.mrf.mxu0 }
 0x2b0   :  { %v574_v36 = vadd.f32 %v1325_v34, %v573_v35  ;;  %v1090_v34 = vsel %vm398_vm0, %v1389_v33, 0  ;;  %v1604_v35 = vld [vmem:[%s2162_s13 + $0x84] ss:$8 sps:$4 sm:$0xff]  }
 0x2b1   :  { %v575_v37 = vpop.f32.mrf.mxu0 }
 0x2b2   :  { %v579_v38 = vmax.f32 %v574_v36, 0.0  ;;  %v1602_v36 = vld [vmem:[%s2162_s13 + $0x80] ss:$8 sps:$4 sm:$0xff]  }
 0x2b3   :  { %v576_v39 = vpop.f32.mrf.mxu0  ;;  %v1605_v37 = vld [vmem:[#allocation8 + $0x38] sm:$0xff]  }
 0x2b4   :  { %v597_v40 = vpack.c.bf16 %v579_v38, %v579_v38  ;;  %v1606_v38 = vld [vmem:[#allocation8 + $0x30] sm:$0xff]   ;;  %v1607_v39 = vld [vmem:[#allocation8 + $0x28] sm:$0xff]  }
 0x2b5   :  { %v577_v41 = vpop.f32.mrf.mxu0 }
 0x2b6   :  { %1440 = vmatmul.mubr.bf16.vlgmr.msra.gmra.mxu1 %v597_v40  ;;  %v1608_v40 = vld [vmem:[#allocation8 + $0x20] sm:$0xff]   ;;  %v1609_v41 = vld [vmem:[#allocation8 + $0x18] sm:$0xff]  }
 0x2b7   :  { %947 = vmatprep.mubr.bf16.mxu1 %v1729_v0  ;;  %916 = vmatpush1.bf16.msra.mxu1 %v1552_v44  ;;  %v1612_v44 = vld [vmem:[#allocation8] sm:$0xff]  }
 0x2b8   :  { %917 = vmatprep.subr.bf16.mxu1 %v1557_v46  ;;  %v828_v46 = vrot.slane %v822_v45, %v1967_v51 }
 0x2bb   :  { %918 = vmatpush1.bf16.msra.mxu1 %v1555_v47  ;;  %v832_v47 = vrot.slane %v822_v45, %v1972_v53 }
 0x2bc   :  { %919 = vmatprep.subr.bf16.mxu1 %v1560_v48 }
 0x2bf   :  { %920 = vmatpush1.bf16.msra.mxu1 %v1558_v49 }
 0x2c0   :  { %921 = vmatprep.subr.bf16.mxu1 %v1563_v50 }
 0x2c3   :  { %922 = vmatpush1.bf16.msra.mxu1 %v1561_v52 }
 0x2c4   :  { %923 = vmatprep.subr.bf16.mxu1 %v1566_v54 }
 0x2c7   :  { %924 = vmatpush1.bf16.msra.mxu1 %v1564_v55 }
 0x2c8   :  { %925 = vmatprep.subr.bf16.mxu1 %v1569_v56 }
 0x2cb   :  { %926 = vmatpush1.bf16.msra.mxu1 %v1567_v57 }
 0x2cc   :  { %927 = vmatprep.subr.bf16.mxu1 %v1572_v58 }
 0x2cf   :  { %928 = vmatpush1.bf16.msra.mxu1 %v1570_v59 }
 0x2d0   :  { %929 = vmatprep.subr.bf16.mxu1 %v1575_v5 }
 0x2d3   :  { %930 = vmatpush1.bf16.msra.mxu1 %v1573_v6 }
 0x2d4   :  { %1229 = vmatprep.subr.bf16.mxu1 %v1729_v0 }
 0x376   :  { %v686_v61 = vpop.f32.mrf.mxu1 }
 0x377   :  { %v687_v62 = vadd.f32 %v1337_v60, %v686_v61  ;;  %v1613_v60 = vld [vmem:[#allocation8 + $0x48] ss:$0 sps:$4 sm:$0x77]  }
 0x378   :  { %v1441_v63 = vpop.f32.mrf.mxu1  ;;  %v1227_v61 = vsel %vm398_vm0, %v1613_v60, 0 }
 0x379   :  { %v692_v1 = vmax.f32 %v687_v62, 0.0  ;;  %v1614_v62 = vld [vmem:[#allocation8 + $0x40] sm:$0xff]   ;;  %v977_v63 = vld [vmem:[%s2163_s14] sm:$0x3]  ;;  %s1732_s14 = smov [#allocation10]  }
 0x37a   :  { %v689_v2 = vpop.f32.mrf.mxu1  ;;  %s1276_s29 = sshll.u32 %s1732_s14, 4  ;;  %s1277_s29 = int_to_ptr.vmem [resolvable:$true] %s1276_s29 }
 0x37b   :  { %v710_v3 = vpack.c.bf16 %v692_v1, %v692_v1  ;;  %v984_v1 = vrot.slane %v977_v63, %v1967_v51  ;;  %v988_v2 = vrot.slane %v977_v63, %v1972_v53  ;;  %s1695_s18 = scalar_lea.vmem %s1277_s29, 128  ;;  %p1700_p7 = scmp.lt.s32.totalorder %s1277_s29, %s1277_s29 }
 0x37c   :  { %v1442_v4 = vpop.f32.mrf.mxu1  ;;  %p1696_p6 = scmp.ne.s32.totalorder %s1277_s29, %s1695_s18  ;;  %p1701_p8 = scmp.lt.s32.totalorder %s1695_s18, %s1695_s18 }
 0x37d   :  { %1460 = vmatmul.mubr.bf16.vlgmr.msra.gmra.mxu0 %v710_v3 }
 0x37e   :  { %1096 = vmatpush1.bf16.msra.mxu0 %v1576_v7  ;;  %p1702_p9 = por %p1701_p8, %p1700_p7 }
 0x37f   :  { %1097 = vmatprep.subr.bf16.mxu0 %v1581_v9 }
 0x380   :  { %p1703_p10 = pnand %p1702_p9, %p1696_p6 }
 0x382   :  { %1098 = vmatpush1.bf16.msra.mxu0 %v1579_v10 }
 0x383   :  { %1099 = vmatprep.subr.bf16.mxu0 %v1584_v11 }
 0x386   :  { %1100 = vmatpush1.bf16.msra.mxu0 %v1582_v12  ;;  %v1393_v12 = vld [vmem:[%s2165_s16] ss:$0 sm:$0xff] }
 0x387   :  { %1101 = vmatprep.subr.bf16.mxu0 %v1587_v13 }
 0x38a   :  { %1102 = vmatpush1.bf16.msra.mxu0 %v1585_v14 }
 0x38b   :  { %1103 = vmatprep.subr.bf16.mxu0 %v1590_v15 }
 0x38e   :  { %1104 = vmatpush1.bf16.msra.mxu0 %v1588_v16 }
 0x38f   :  { %1105 = vmatprep.subr.bf16.mxu0 %v1593_v17 }
 0x392   :  { %1106 = vmatpush1.bf16.msra.mxu0 %v1591_v18 }
 0x393   :  { %1107 = vmatprep.subr.bf16.mxu0 %v1596_v19 }
 0x396   :  { %1108 = vmatpush1.bf16.msra.mxu0 %v1594_v20 }
 0x397   :  { %1109 = vmatprep.subr.bf16.mxu0 %v1599_v21 }
 0x39a   :  { %1110 = vmatpush1.bf16.msra.mxu0 %v1597_v22 }
 0x39b   :  { %1391 = vmatprep.subr.msk.bf16.mxu0 %vm398_vm0, %v1390_v32 }
 0x39e   :  { %1124 = vmatpush2.bf16.msra.mxu0 %v1090_v34 }
 0x39f   :  { %1125 = vmatprep.subr.bf16.mxu0 %v1604_v35 }
 0x3a2   :  { %1126 = vmatpush2.bf16.msra.mxu0 %v1602_v36 }
 0x43d   :  { %v799_v24 = vpop.f32.mrf.mxu0 }
 0x43e   :  { %v800_v25 = vadd.f32 %v1346_v23, %v799_v24 }
 0x43f   :  { %v1461_v26 = vpop.f32.mrf.mxu0 }
 0x440   :  { %v805_v27 = vmax.f32 %v800_v25, 0.0 }
 0x441   :  { %v802_v28 = vpop.f32.mrf.mxu0 }
 0x442   :  { %v823_v29 = vpack.c.bf16 %v805_v27, %v805_v27 }
 0x443   :  { %v1462_v30 = vpop.f32.mrf.mxu0 }
 0x444   :  { %948 = vmatmul.mubr.bf16.vlgmr.msra.gmra.mxu1 %v823_v29 }
 0x445   :  { %1230 = vmatpush1.bf16.msra.mxu1 %v1605_v37 }
 0x446   :  { %1231 = vmatprep.subr.bf16.mxu1 %v1729_v0 }
 0x449   :  { %1232 = vmatpush1.bf16.msra.mxu1 %v1606_v38 }
 0x44a   :  { %1233 = vmatprep.subr.bf16.mxu1 %v1729_v0 }
 0x44d   :  { %1234 = vmatpush1.bf16.msra.mxu1 %v1607_v39 }
 0x44e   :  { %1235 = vmatprep.subr.bf16.mxu1 %v1729_v0 }
 0x451   :  { %1236 = vmatpush1.bf16.msra.mxu1 %v1608_v40 }
 0x452   :  { %1237 = vmatprep.subr.bf16.mxu1 %v1729_v0 }
 0x455   :  { %1238 = vmatpush1.bf16.msra.mxu1 %v1609_v41 }
 0x456   :  { %1239 = vmatprep.subr.bf16.mxu1 %v1729_v0 }
 0x459   :  { %1240 = vmatpush1.bf16.msra.mxu1 %v1610_v42 }
 0x45a   :  { %1241 = vmatprep.subr.bf16.mxu1 %v1729_v0 }
 0x45d   :  { %1242 = vmatpush1.bf16.msra.mxu1 %v1611_v43 }
 0x45e   :  { %1243 = vmatprep.subr.bf16.mxu1 %v1729_v0 }
 0x461   :  { %1244 = vmatpush1.bf16.msra.mxu1 %v1612_v44 }
 0x462   :  { %1257 = vmatprep.subr.bf16.mxu1 %v1729_v0 }
 0x465   :  { %1258 = vmatpush2.bf16.msra.mxu1 %v1227_v61 }
 0x466   :  { %1259 = vmatprep.subr.bf16.mxu1 %v1729_v0 }
 0x469   :  { %1260 = vmatpush2.bf16.msra.mxu1 %v1614_v62 }
 0x504   :  { %v949_v48 = vpop.f32.mrf.mxu1 }
 0x505   :  { %v950_v49 = vadd.f32 %v949_v48, %v828_v46 }
 0x506   :  { %v951_v50 = vpop.f32.mrf.mxu1 }
 0x507   :  { %v952_v52 = vadd.f32 %v951_v50, %v832_v47  ;;  %v956_v54 = vmax.f32 %v950_v49, 0.0 }
 0x508   :  { %v953_v55 = vpop.f32.mrf.mxu1 }
 0x509   :  { %v957_v56 = vmax.f32 %v952_v52, 0.0  ;;  %v978_v59 = vpack.c.bf16 %v956_v54, %v956_v54 }
 0x50a   :  { %v954_v57 = vpop.f32.mrf.mxu1 }
 0x50b   :  { %v979_v58 = vpack.c.bf16 %v957_v56, %v957_v56 }
 0x50d   :  { %1392 = vmatprep.mubr.msk.bf16.mxu0 %vm394_vm1, %v979_v58 }
 0x50e   :  { %1128 = vmatmul.mubr.bf16.vlgmr.msra.gmra.mxu0 %v978_v59 }
 0x5ce   :  { %v1129_v3 = vpop.f32.mrf.mxu0 }
 0x5cf   :  { %v1130_v4 = vadd.f32 %v1129_v3, %v984_v1 }
 0x5d0   :  { %v1131_v5 = vpop.f32.mrf.mxu0 }
 0x5d1   :  { %v1132_v6 = vadd.f32 %v1131_v5, %v988_v2  ;;  %v1136_v7 = vmax.f32 %v1130_v4, 0.0 }
 0x5d2   :  { %v1133_v8 = vpop.f32.mrf.mxu0 }
 0x5d3   :  { %v1137_v9 = vmax.f32 %v1132_v6, 0.0  ;;  %v1158_v0 = vpack.c.bf16 %v1136_v7, %v1136_v7 }
 0x5d4   :  { %v1134_v10 = vpop.f32.mrf.mxu0 }
 0x5d5   :  { %v1159_v11 = vpack.c.bf16 %v1137_v9, %v1137_v9 }
 0x5d7   :  { %1404 = vmatprep.mubr.msk.bf16.mxu1 %vm394_vm1, %v1159_v11 }
 0x5d8   :  { %1262 = vmatmul.mubr.bf16.vlgmr.msra.gmra.mxu1 %v1158_v0 }
 0x698   :  { %v1263_v51 = vpop.f32.mrf.mxu1 }
 0x699   :  { %v1264_v53 = vadd.f32 %v1393_v12, %v1263_v51 }
 0x69a   :  { %v1265_v13 = vpop.f32.mrf.mxu1 }
 0x69b   :  { %1269 = vst [vmem:[#allocation10] sm:$0xff] %v1264_v53 }
 0x69c   :  { %v1266_v14 = vpop.f32.mrf.mxu1 }
 0x69d   :  { %1706 = shalt.err (!%p1703_p10)
}
 0x69e   :  { %1279 = dma.vmem_to_hbm [thread:$0]  %s1277_s29, 128, %s2166_s17, [#allocation4]   ;;  %v1267_v15 = vpop.f32.mrf.mxu1 }
 0x69f   :  { %1721 = dma.done.wait [#allocation4], 128  }
 0x6a0   :  { %1722 = vsyncadd [#allocation4], 4294967168 }
 0x6a1   :  { %1283 = vsyncpa [#allocation3], 1 }
 0x6a2   :  { %1284 = vsyncpa [#allocation6], 1 }
 0x6a3   :  { %1285 = vsyncpa [#allocation9], 1 }
 0x6a4   :  { %1286 = vsyncpa [#allocation4], 1 }

</bundles_post_ra>
